<compile_context>
chip_gen: v7x
topology: tpu7x:2x2x1
jax: 0.10.0
libtpu: 0.0.40
codegen_flags: <defaults>
</compile_context>

<pallas_src>
import jax
import jax.numpy as jnp
from jax import lax
from jax.experimental import pallas as pl
from jax.experimental.pallas import tpu as pltpu

LANE = 128            # vreg lane width
SUBLANE = 8           # vreg sublane count (fold target / row-pad granule)
MAX_ROW_TILE = 2048   # rows per tile: 2048*128*4B = 1 MiB per f32 stream per buffer
PAD_LOGIT = -1e9      # MUST stay finite (-inf * 0 = NaN); with target 0 every term is exactly 0


def _num_tc_splits():
    """Partial-sum blocks = TensorCores per chip: 2 on v7x, 1 on v5e/v6e (and older)."""
    try:
        kind = jax.devices()[0].device_kind.lower()
    except Exception:
        return 1
    return 2 if "7" in kind else 1


def _make_kernel(row_tile, blocks_per_split, rows_valid, needs_mask):
    def kernel(pred_ref, targ_ref, out_ref):
        # grid = (split, block); axis 1 is the sequential reduction axis.
        k = pl.program_id(1)

        @pl.when(k == 0)
        def _():
            out_ref[...] = jnp.zeros_like(out_ref)

        # Native dtypes travel over HBM; upcast in VMEM (no wrapper cast pass).
        x = pred_ref[...].astype(jnp.float32)     # (row_tile, 128)
        t = targ_ref[...].astype(jnp.float32)

        if needs_mask:
            # Rows at/after `rows_valid` (partial last block, or a clamped
            # out-of-range block on the split axis) are forced to the
            # self-cancelling pad values -> exactly 0 contribution.
            start_row = (pl.program_id(0) * blocks_per_split + k) * row_tile
            rows_left = rows_valid - start_row
            rid = lax.broadcasted_iota(jnp.int32, (row_tile, LANE), 0)
            keep = rid < rows_left
            x = jnp.where(keep, x, PAD_LOGIT)
            t = jnp.where(keep, t, 0.0)

        # One shared EUP exp serves BCE-with-logits and the stable sigmoid:
        #   bce = max(x,0) - x*t + log(1 + exp(-|x|))
        #   p   = sigmoid(x) = 1/(1+e) if x>=0 else e/(1+e),  e = exp(-|x|)
        # e is in (0, 1], so log(1+e) is within ~1 ulp of log1p(e) on this range;
        # do NOT "fix" this with a log1p emulation on the hot path.
        e = jnp.exp(-jnp.abs(x))
        one_pe = 1.0 + e
        bce = jnp.maximum(x, 0.0) - x * t + jnp.log(one_pe)
        inv = pl.reciprocal(one_pe, approx=True)
        inv = inv * (2.0 - one_pe * inv)          # one Newton step -> ~f32 accurate
        p = jnp.where(x >= 0.0, inv, e * inv)

        def fold(v):
            # (row_tile, 128) -> (8, 128) partial sums using only VPU adds
            # (no cross-lane/XLU work in the hot loop).  row_tile % 8 == 0 by
            # construction.
            return jnp.sum(v.reshape(-1, SUBLANE, LANE), axis=0)

        # Output block (1, 4, 8, 128) keeps the same index across k, so it stays
        # resident in VMEM and acts as the accumulator: [bce, p*t, p, t].
        out_ref[0, 0] += fold(bce)
        out_ref[0, 1] += fold(p * t)
        out_ref[0, 2] += fold(p)
        out_ref[0, 3] += fold(t)

    return kernel


def combined_loss(predictions, targets, *, alpha=0.5, smooth=1e-6):
    """Equivalent of CombinedLoss(alpha)(predictions, targets) on NCHW logits."""
    n = int(predictions.size)
    assert int(targets.size) == n

    # No dtype casts here: pass native dtypes through HBM, upcast inside the kernel.
    pred_flat = jnp.ravel(predictions)
    targ_flat = jnp.ravel(targets)

    # Pad only up to a multiple of 8*128 = 1024 elements (usually zero -> the
    # reshape below is a pure view, no extra HBM round trip).  Pad values are
    # self-cancelling: pred=PAD_LOGIT, target=0 contribute exactly 0 everywhere.
    # NOTE: targets must be hard 0/1 labels for exact parity with the PyTorch ref
    # only in the sense of the loss formula; soft targets are handled exactly too
    # since no low-precision target cast is performed anymore.
    pad = (-n) % (SUBLANE * LANE)
    if pad:
        pred_flat = jnp.pad(pred_flat, (0, pad), constant_values=PAD_LOGIT)
        targ_flat = jnp.pad(targ_flat, (0, pad))

    rows = (n + pad) // LANE                      # multiple of 8
    pred2 = pred_flat.reshape(rows, LANE)
    targ2 = targ_flat.reshape(rows, LANE)

    row_tile = min(MAX_ROW_TILE, rows)            # multiple of 8 (or full array)
    blocks = -(-rows // row_tile)
    num_splits = min(_num_tc_splits(), blocks)    # 1 on v5e/v6e, up to 2 on v7x
    blocks_per_split = -(-blocks // num_splits)
    # Mask needed iff the rectangular grid over-covers the real rows (partial last
    # block and/or an out-of-range block on the split axis).
    needs_mask = (num_splits * blocks_per_split * row_tile) != rows

    if num_splits * blocks_per_split > blocks:
        # Rare: odd block count with 2 splits.  Clamp so the DMA re-reads the last
        # valid block; the in-kernel row mask zeroes its contribution.
        def in_map(j, k):
            return (jnp.minimum(j * blocks_per_split + k, blocks - 1), 0)
    else:
        def in_map(j, k):
            return (j * blocks_per_split + k, 0)

    kernel = _make_kernel(row_tile, blocks_per_split, rows, needs_mask)

    partials = pl.pallas_call(
        kernel,
        out_shape=jax.ShapeDtypeStruct((num_splits, 4, SUBLANE, LANE), jnp.float32),
        grid_spec=pltpu.PrefetchScalarGridSpec(
            num_scalar_prefetch=0,
            grid=(num_splits, blocks_per_split),
            in_specs=[
                pl.BlockSpec((row_tile, LANE), in_map),
                pl.BlockSpec((row_tile, LANE), in_map),
            ],
            out_specs=pl.BlockSpec((1, 4, SUBLANE, LANE),
                                   lambda j, k: (j, 0, 0, 0)),
        ),
        # On v7x, verify with xprof that the leading axis shards across both
        # TensorCores; if not, switch it to pltpu.CORE_PARALLEL.
        compiler_params=pltpu.CompilerParams(
            dimension_semantics=("parallel", "arbitrary")),
    )(pred2, targ2)

    # Single cross-lane/sublane reduction + per-split combine, done once outside
    # the hot loop (tiny: num_splits*4*8*128 elements).
    sums = jnp.sum(partials, axis=(0, 2, 3))      # [sum(bce), sum(p*t), sum(p), sum(t)]
    bce_loss = sums[0] / n
    dice = (2.0 * sums[1] + smooth) / (sums[2] + sums[3] + smooth)
    dice_loss = 1.0 - dice
    return alpha * bce_loss + (1.0 - alpha) * dice_loss


def _reference_loss(predictions, targets, alpha=0.5, smooth=1e-6):
    x = predictions.astype(jnp.float32)
    t = targets.astype(jnp.float32)
    bce = jnp.mean(jnp.maximum(x, 0.0) - x * t + jnp.log1p(jnp.exp(-jnp.abs(x))))
    p = jax.nn.sigmoid(x).reshape(-1)
    tt = t.reshape(-1)
    inter = jnp.sum(p * tt)
    total = jnp.sum(p) + jnp.sum(tt)
    dice = (2.0 * inter + smooth) / (total + smooth)
    return alpha * bce + (1.0 - alpha) * (1.0 - dice)


if __name__ == "__main__":
    key = jax.random.PRNGKey(0)
    k1, k2 = jax.random.split(key)
    # Small segmentation-style shapes: batch=2, channels=4, spatial=16x16 (NCHW).
    predictions = jax.random.normal(k1, (2, 4, 16, 16), dtype=jnp.float32)
    targets = (jax.random.uniform(k2, (2, 4, 16, 16)) > 0.5).astype(jnp.float32)

    loss = combined_loss(predictions, targets)
    loss = jax.block_until_ready(loss)

    ref = _reference_loss(predictions, targets)
    assert jnp.allclose(loss, ref, rtol=1e-5, atol=1e-5), (loss, ref)
    print("KERNEL_OK")
</pallas_src>

<mosaic_0001>
module attributes {stable_mosaic.version = 11 : i64} {
  func.func @kernel(%arg0: i32, %arg1: i32, %arg2: memref<16x128xf32, #tpu.memory_space<vmem>>, %arg3: memref<16x128xf32, #tpu.memory_space<vmem>>, %arg4: memref<1x4x8x128xf32, #tpu.memory_space<vmem>>) attributes {dimension_semantics = [#tpu.dimension_semantics<parallel>, #tpu.dimension_semantics<arbitrary>], iteration_bounds = array<i64: 1, 1>, scalar_prefetch = 0 : i64, scratch_operands = 0 : i64, tpu.core_type = #tpu.core_type<tc>, window_params = [{transform_indices = @transform_0, window_bounds = array<i64: 16, 128>}, {transform_indices = @transform_1, window_bounds = array<i64: 16, 128>}, {transform_indices = @transform_2, window_bounds = array<i64: 1, 4, 8, 128>}]} {
    %c0_i32 = arith.constant 0 : i32
    %0 = arith.cmpi eq, %arg1, %c0_i32 : i32
    %1 = arith.extui %0 : i1 to i32
    %c0_i32_0 = arith.constant 0 : i32
    %2 = arith.cmpi ne, %1, %c0_i32_0 : i32
    scf.if %2 {
      %cst_41 = arith.constant 0.000000e+00 : f32
      %59 = vector.broadcast %cst_41 : f32 to vector<1x4x8x128xf32>
      %c0_42 = arith.constant 0 : index
      %c0_43 = arith.constant 0 : index
      %c0_44 = arith.constant 0 : index
      %c0_45 = arith.constant 0 : index
      %60 = vector.load %arg4[%c0_42, %c0_43, %c0_44, %c0_45] : memref<1x4x8x128xf32, #tpu.memory_space<vmem>>, vector<1x4x8x128xf32>
      tpu.vector_store %arg4[%c0_42, %c0_43, %c0_44, %c0_45], %59 {strides = array<i32>} : memref<1x4x8x128xf32, #tpu.memory_space<vmem>>, vector<1x4x8x128xf32>,
    } else {
    }
    %c0 = arith.constant 0 : index
    %c0_1 = arith.constant 0 : index
    %3 = vector.load %arg2[%c0, %c0_1] : memref<16x128xf32, #tpu.memory_space<vmem>>, vector<16x128xf32>
    %c0_2 = arith.constant 0 : index
    %c0_3 = arith.constant 0 : index
    %4 = vector.load %arg3[%c0_2, %c0_3] : memref<16x128xf32, #tpu.memory_space<vmem>>, vector<16x128xf32>
    %5 = math.absf %3 : vector<16x128xf32>
    %cst = arith.constant 0.000000e+00 : f32
    %6 = vector.broadcast %cst : f32 to vector<16x128xf32>
    %7 = arith.subf %6, %5 : vector<16x128xf32>
    %8 = math.exp %7 : vector<16x128xf32>
    %cst_4 = arith.constant 1.000000e+00 : f32
    %9 = vector.broadcast %cst_4 : f32 to vector<16x128xf32>
    %10 = arith.addf %9, %8 : vector<16x128xf32>
    %cst_5 = arith.constant 0.000000e+00 : f32
    %11 = vector.broadcast %cst_5 : f32 to vector<16x128xf32>
    %12 = arith.maximumf %3, %11 : vector<16x128xf32>
    %13 = arith.mulf %3, %4 : vector<16x128xf32>
    %14 = arith.subf %12, %13 : vector<16x128xf32>
    %15 = math.log %10 : vector<16x128xf32>
    %16 = arith.addf %14, %15 : vector<16x128xf32>
    %17 = tpu.reciprocal %10 {approx = true} : vector<16x128xf32> -> vector<16x128xf32>
    %18 = arith.mulf %10, %17 : vector<16x128xf32>
    %cst_6 = arith.constant 2.000000e+00 : f32
    %19 = vector.broadcast %cst_6 : f32 to vector<16x128xf32>
    %20 = arith.subf %19, %18 : vector<16x128xf32>
    %21 = arith.mulf %17, %20 : vector<16x128xf32>
    %cst_7 = arith.constant 0.000000e+00 : f32
    %22 = vector.broadcast %cst_7 : f32 to vector<16x128xf32>
    %23 = arith.cmpf oge, %3, %22 : vector<16x128xf32>
    %24 = arith.mulf %8, %21 : vector<16x128xf32>
    %25 = arith.select %23, %21, %24 : vector<16x128xi1>, vector<16x128xf32>
    %c0_8 = arith.constant 0 : index
    %c0_9 = arith.constant 0 : index
    %c0_10 = arith.constant 0 : index
    %c0_11 = arith.constant 0 : index
    %26 = vector.load %arg4[%c0_8, %c0_9, %c0_10, %c0_11] : memref<1x4x8x128xf32, #tpu.memory_space<vmem>>, vector<1x1x8x128xf32>
    %27 = vector.shape_cast %26 : vector<1x1x8x128xf32> to vector<8x128xf32>
    %28 = vector.shape_cast %16 : vector<16x128xf32> to vector<2x8x128xf32>
    %cst_12 = arith.constant dense<0.000000e+00> : vector<8x128xf32>
    %29 = vector.multi_reduction <add>, %28, %cst_12 [0] : vector<2x8x128xf32> to vector<8x128xf32>
    %30 = arith.addf %27, %29 : vector<8x128xf32>
    %c0_13 = arith.constant 0 : index
    %c0_14 = arith.constant 0 : index
    %c0_15 = arith.constant 0 : index
    %c0_16 = arith.constant 0 : index
    %31 = vector.load %arg4[%c0_13, %c0_14, %c0_15, %c0_16] : memref<1x4x8x128xf32, #tpu.memory_space<vmem>>, vector<1x1x8x128xf32>
    %32 = vector.shape_cast %31 : vector<1x1x8x128xf32> to vector<8x128xf32>
    %33 = vector.shape_cast %30 : vector<8x128xf32> to vector<1x1x8x128xf32>
    tpu.vector_store %arg4[%c0_13, %c0_14, %c0_15, %c0_16], %33 {strides = array<i32>} : memref<1x4x8x128xf32, #tpu.memory_space<vmem>>, vector<1x1x8x128xf32>,
    %c0_17 = arith.constant 0 : index
    %c1 = arith.constant 1 : index
    %c0_18 = arith.constant 0 : index
    %c0_19 = arith.constant 0 : index
    %34 = vector.load %arg4[%c0_17, %c1, %c0_18, %c0_19] : memref<1x4x8x128xf32, #tpu.memory_space<vmem>>, vector<1x1x8x128xf32>
    %35 = vector.shape_cast %34 : vector<1x1x8x128xf32> to vector<8x128xf32>
    %36 = arith.mulf %25, %4 : vector<16x128xf32>
    %37 = vector.shape_cast %36 : vector<16x128xf32> to vector<2x8x128xf32>
    %cst_20 = arith.constant dense<0.000000e+00> : vector<8x128xf32>
    %38 = vector.multi_reduction <add>, %37, %cst_20 [0] : vector<2x8x128xf32> to vector<8x128xf32>
    %39 = arith.addf %35, %38 : vector<8x128xf32>
    %c0_21 = arith.constant 0 : index
    %c1_22 = arith.constant 1 : index
    %c0_23 = arith.constant 0 : index
    %c0_24 = arith.constant 0 : index
    %40 = vector.load %arg4[%c0_21, %c1_22, %c0_23, %c0_24] : memref<1x4x8x128xf32, #tpu.memory_space<vmem>>, vector<1x1x8x128xf32>
    %41 = vector.shape_cast %40 : vector<1x1x8x128xf32> to vector<8x128xf32>
    %42 = vector.shape_cast %39 : vector<8x128xf32> to vector<1x1x8x128xf32>
    tpu.vector_store %arg4[%c0_21, %c1_22, %c0_23, %c0_24], %42 {strides = array<i32>} : memref<1x4x8x128xf32, #tpu.memory_space<vmem>>, vector<1x1x8x128xf32>,
    %c0_25 = arith.constant 0 : index
    %c2 = arith.constant 2 : index
    %c0_26 = arith.constant 0 : index
    %c0_27 = arith.constant 0 : index
    %43 = vector.load %arg4[%c0_25, %c2, %c0_26, %c0_27] : memref<1x4x8x128xf32, #tpu.memory_space<vmem>>, vector<1x1x8x128xf32>
    %44 = vector.shape_cast %43 : vector<1x1x8x128xf32> to vector<8x128xf32>
    %45 = vector.shape_cast %25 : vector<16x128xf32> to vector<2x8x128xf32>
    %cst_28 = arith.constant dense<0.000000e+00> : vector<8x128xf32>
    %46 = vector.multi_reduction <add>, %45, %cst_28 [0] : vector<2x8x128xf32> to vector<8x128xf32>
    %47 = arith.addf %44, %46 : vector<8x128xf32>
    %c0_29 = arith.constant 0 : index
    %c2_30 = arith.constant 2 : index
    %c0_31 = arith.constant 0 : index
    %c0_32 = arith.constant 0 : index
    %48 = vector.load %arg4[%c0_29, %c2_30, %c0_31, %c0_32] : memref<1x4x8x128xf32, #tpu.memory_space<vmem>>, vector<1x1x8x128xf32>
    %49 = vector.shape_cast %48 : vector<1x1x8x128xf32> to vector<8x128xf32>
    %50 = vector.shape_cast %47 : vector<8x128xf32> to vector<1x1x8x128xf32>
    tpu.vector_store %arg4[%c0_29, %c2_30, %c0_31, %c0_32], %50 {strides = array<i32>} : memref<1x4x8x128xf32, #tpu.memory_space<vmem>>, vector<1x1x8x128xf32>,
    %c0_33 = arith.constant 0 : index
    %c3 = arith.constant 3 : index
    %c0_34 = arith.constant 0 : index
    %c0_35 = arith.constant 0 : index
    %51 = vector.load %arg4[%c0_33, %c3, %c0_34, %c0_35] : memref<1x4x8x128xf32, #tpu.memory_space<vmem>>, vector<1x1x8x128xf32>
    %52 = vector.shape_cast %51 : vector<1x1x8x128xf32> to vector<8x128xf32>
    %53 = vector.shape_cast %4 : vector<16x128xf32> to vector<2x8x128xf32>
    %cst_36 = arith.constant dense<0.000000e+00> : vector<8x128xf32>
    %54 = vector.multi_reduction <add>, %53, %cst_36 [0] : vector<2x8x128xf32> to vector<8x128xf32>
    %55 = arith.addf %52, %54 : vector<8x128xf32>
    %c0_37 = arith.constant 0 : index
    %c3_38 = arith.constant 3 : index
    %c0_39 = arith.constant 0 : index
    %c0_40 = arith.constant 0 : index
    %56 = vector.load %arg4[%c0_37, %c3_38, %c0_39, %c0_40] : memref<1x4x8x128xf32, #tpu.memory_space<vmem>>, vector<1x1x8x128xf32>
    %57 = vector.shape_cast %56 : vector<1x1x8x128xf32> to vector<8x128xf32>
    %58 = vector.shape_cast %55 : vector<8x128xf32> to vector<1x1x8x128xf32>
    tpu.vector_store %arg4[%c0_37, %c3_38, %c0_39, %c0_40], %58 {strides = array<i32>} : memref<1x4x8x128xf32, #tpu.memory_space<vmem>>, vector<1x1x8x128xf32>,
    return
  }
  func.func @transform_0(%arg0: i32, %arg1: i32) -> (i32, i32) {
    %c1_i32 = arith.constant 1 : i32
    %0 = arith.muli %arg0, %c1_i32 : i32
    %1 = arith.addi %0, %arg1 : i32
    %c0_i32 = arith.constant 0 : i32
    %c0_i32_0 = arith.constant 0 : i32
    return %1, %c0_i32 : i32, i32
  }
  func.func @transform_1(%arg0: i32, %arg1: i32) -> (i32, i32) {
    %c1_i32 = arith.constant 1 : i32
    %0 = arith.muli %arg0, %c1_i32 : i32
    %1 = arith.addi %0, %arg1 : i32
    %c0_i32 = arith.constant 0 : i32
    %c0_i32_0 = arith.constant 0 : i32
    return %1, %c0_i32 : i32, i32
  }
  func.func @transform_2(%arg0: i32, %arg1: i32) -> (i32, i32, i32, i32) {
    %c0_i32 = arith.constant 0 : i32
    %c0_i32_0 = arith.constant 0 : i32
    %c0_i32_1 = arith.constant 0 : i32
    %c0_i32_2 = arith.constant 0 : i32
    return %arg0, %c0_i32, %c0_i32_0, %c0_i32_1 : i32, i32, i32, i32
  }
}

</mosaic_0001>

<bundles_post_ra>
// kernel: tpu_custom_call.1
= control target key start
LH: loop header
LB: loop body
LE: loop exit
PB: predicated region body
PF: predicated region fallthrough
CT: control target
= control target key end

     0   :  { %7 = vsyncpa [#allocation3], 0  ;;  %s294_s0 = inlined_call_operand.hbm [shape: f32[16,128], index: 0, kind: input, shape index: {}]   ;;  %s295_s1 = inlined_call_operand.hbm [shape: f32[16,128], index: 1, kind: input, shape index: {}]   ;;  %s296_s2 = inlined_call_operand.hbm [shape: f32[1,4,8,128], index: 2, kind: output, shape index: {}]  }
   0x1   :  { %8 = vsyncpa [#allocation6], 0 }
   0x2   :  { %9 = vsyncpa [#allocation4], 0  ;;  %s229_s9 = smov [#allocation2]   ;;  %s157_s13 = scalar_lea.hbm %s294_s0, 256 }
   0x3   :  { %s19_s10 = sshll.u32 %s229_s9, 4  ;;  %p158_p0 = scmp.ne.s32.totalorder %s294_s0, %s157_s13  ;;  %s20_s10 = int_to_ptr.vmem [resolvable:$true] %s19_s10 }
   0x4   :  { %p161_p1 = scmp.lt.u32.totalorder %s157_s13, %s294_s0 }
   0x6   :  { %p163_p2 = pnand %p161_p1, %p158_p0 }
   0x8   :  { %166 = shalt.err (!%p163_p2)
}
   0x9   :  { %s167_s18 = scalar_lea.vmem %s20_s10, 256  ;;  %p172_p4 = scmp.lt.s32.totalorder %s20_s10, %s20_s10 }
   0xa   :  { %p168_p3 = scmp.ne.s32.totalorder %s20_s10, %s167_s18  ;;  %p173_p5 = scmp.lt.s32.totalorder %s167_s18, %s167_s18 }
   0xc   :  { %p174_p6 = por %p173_p5, %p172_p4 }
   0xe   :  { %p175_p7 = pnand %p174_p6, %p168_p3 }
  0x10   :  { %178 = shalt.err (!%p175_p7)
}
  0x11   :  { %s230_s19 = smov 128   ;;  %s231_s20 = smov 8  }
  0x12   :  { %25 = dma.hbm_to_vmem [thread:$0]  %s294_s0, 256, %s20_s10, [#allocation3], %s230_s19, %s230_s19, %s231_s20  }
  0x13   :  { %s232_s23 = smov [#allocation5]   ;;  %s179_s27 = scalar_lea.hbm %s295_s1, 256 }
  0x14   :  { %s35_s24 = sshll.u32 %s232_s23, 4  ;;  %p180_p8 = scmp.ne.s32.totalorder %s295_s1, %s179_s27  ;;  %s36_s24 = int_to_ptr.vmem [resolvable:$true] %s35_s24 }
  0x15   :  { %p183_p9 = scmp.lt.u32.totalorder %s179_s27, %s295_s1 }
  0x17   :  { %p185_p10 = pnand %p183_p9, %p180_p8 }
  0x19   :  { %188 = shalt.err (!%p185_p10)
}
  0x1a   :  { %s189_s4 = scalar_lea.vmem %s36_s24, 256  ;;  %p194_p12 = scmp.lt.s32.totalorder %s36_s24, %s36_s24 }
  0x1b   :  { %p190_p11 = scmp.ne.s32.totalorder %s36_s24, %s189_s4  ;;  %p195_p13 = scmp.lt.s32.totalorder %s189_s4, %s189_s4 }
  0x1d   :  { %p196_p0 = por %p195_p13, %p194_p12 }
  0x1f   :  { %p197_p1 = pnand %p196_p0, %p190_p11 }
  0x21   :  { %200 = shalt.err (!%p197_p1)
}
  0x22   :  { %41 = dma.hbm_to_vmem [thread:$0]  %s295_s1, 256, %s36_s24, [#allocation6], %s230_s19, %s230_s19, %s231_s20  }
  0x23   :  { %223 = dma.done.wait [#allocation3], 256  }
  0x24   :  { %224 = vsyncadd [#allocation3], 4294967040 }
  0x25   :  { %225 = dma.done.wait [#allocation6], 256  }
  0x26   :  { %226 = vsyncadd [#allocation6], 4294967040  ;;  %v60_v0 = vld [vmem:[#allocation2] sm:$0xff]  ;;  %v61_v1 = vld [vmem:[#allocation2 + $0x8] sm:$0xff]  ;;  %s233_s1 = smov [#allocation7]  }
  0x27   :  { %v64_v2 = vand.u32 2147483647, %v60_v0  ;;  %v65_v3 = vand.u32 2147483647, %v61_v1  ;;  %v62_v4 = vld [vmem:[#allocation5] sm:$0xff]  ;;  %v63_v5 = vld [vmem:[#allocation5 + $0x8] sm:$0xff] }
  0x28   :  { %v118_v8 = vadd.f32 %v63_v5, %v62_v4  ;;  %v74_v15 = vmax.f32 %v60_v0, 0.0  ;;  %v76_v16 = vmul.f32 %v62_v4, %v60_v0  ;;  %v75_v17 = vmax.f32 %v61_v1, 0.0  ;;  %s126_s6 = sshll.u32 %s233_s1, 4  ;;  %s127_s6 = int_to_ptr.vmem [resolvable:$true] %s126_s6 }
  0x29   :  { %v66_v6 = vsub.f32 0.0, %v64_v2  ;;  %v67_v7 = vsub.f32 0.0, %v65_v3  ;;  %v77_v18 = vmul.f32 %v63_v5, %v61_v1  ;;  %vm94_vm0 = vcmp.ge.f32.partialorder %v60_v0, 0.0  ;;  %s201_s7 = scalar_lea.vmem %s127_s6, 512  ;;  %p206_p3 = scmp.lt.s32.totalorder %s127_s6, %s127_s6 }
  0x2a   :  { %120 = vst [vmem:[#allocation7 + $0x18] sm:$0xff] %v118_v8  ;;  %v78_v19 = vsub.f32 %v74_v15, %v76_v16  ;;  %vm95_vm1 = vcmp.ge.f32.partialorder %v61_v1, 0.0  ;;  %p202_p2 = scmp.ne.s32.totalorder %s127_s6, %s201_s7  ;;  %p207_p4 = scmp.lt.s32.totalorder %s201_s7, %s201_s7 }
  0x2b   :  { %v68_v9 = vmul.f32 1.442695, %v66_v6  ;;  %v70_v10 = vmul.f32 1.442695, %v67_v7  ;;  %v79_v21 = vsub.f32 %v75_v17, %v77_v18 }
  0x2c   :  { %p208_p5 = por %p207_p4, %p206_p3 }
  0x2d   :  { %145 = vpow2.f32 %v68_v9 }
  0x2e   :  { %147 = vpow2.f32 %v70_v10  ;;  %p209_p6 = pnand %p208_p5, %p202_p2 }
  0x37   :  { %v146_v11 = vpop.eup %145 }
  0x38   :  { %v148_v12 = vpop.eup %147  ;;  %v72_v13 = vadd.f32 1.0, %v146_v11 }
  0x39   :  { %v73_v14 = vadd.f32 1.0, %v148_v12 }
  0x3a   :  { %149 = vlog2.f32 %v72_v13 }
  0x3b   :  { %151 = vlog2.f32 %v73_v14 }
  0x3c   :  { %153 = vrcp.f32 %v72_v13 }
  0x3d   :  { %155 = vrcp.f32 %v73_v14 }
  0x44   :  { %v150_v20 = vpop.eup %149 }
  0x45   :  { %v152_v22 = vpop.eup %151  ;;  %v81_v23 = vmul.f32 0.6931472, %v150_v20 }
  0x46   :  { %v154_v24 = vpop.eup %153  ;;  %v83_v25 = vmul.f32 0.6931472, %v152_v22 }
  0x47   :  { %v156_v26 = vpop.eup %155  ;;  %v84_v27 = vadd.f32 %v81_v23, %v78_v19  ;;  %v88_v28 = vmul.f32 %v154_v24, %v72_v13 }
  0x48   :  { %v85_v29 = vadd.f32 %v83_v25, %v79_v21  ;;  %v89_v30 = vmul.f32 %v156_v26, %v73_v14 }
  0x49   :  { %v90_v31 = vsub.f32 2.0, %v88_v28 }
  0x4a   :  { %v101_v32 = vadd.f32 %v85_v29, %v84_v27  ;;  %v91_v33 = vsub.f32 2.0, %v89_v30 }
  0x4b   :  { %v92_v34 = vmul.f32 %v154_v24, %v90_v31 }
  0x4c   :  { %v93_v35 = vmul.f32 %v156_v26, %v91_v33  ;;  %103 = vst [vmem:[#allocation7] sm:$0xff] %v101_v32 }
  0x4d   :  { %v96_v36 = vmul.f32 %v146_v11, %v92_v34 }
  0x4e   :  { %v97_v37 = vmul.f32 %v148_v12, %v93_v35 }
  0x4f   :  { %v98_v38 = vsel %vm94_vm0, %v92_v34, %v96_v36 }
  0x50   :  { %v99_v39 = vsel %vm95_vm1, %v93_v35, %v97_v37  ;;  %v106_v40 = vmul.f32 %v98_v38, %v62_v4 }
  0x51   :  { %v107_v41 = vmul.f32 %v99_v39, %v63_v5  ;;  %v113_v42 = vadd.f32 %v99_v39, %v98_v38 }
  0x53   :  { %v108_v43 = vadd.f32 %v107_v41, %v106_v40  ;;  %115 = vst [vmem:[#allocation7 + $0x10] sm:$0xff] %v113_v42 }
  0x55   :  { %110 = vst [vmem:[#allocation7 + $0x8] sm:$0xff] %v108_v43 }
  0x56   :  { %212 = shalt.err (!%p209_p6)
}
  0x57   :  { %s213_s10 = scalar_lea.hbm %s296_s2, 512 }
  0x58   :  { %p214_p7 = scmp.ne.s32.totalorder %s296_s2, %s213_s10  ;;  %p217_p8 = scmp.lt.u32.totalorder %s213_s10, %s296_s2 }
  0x5a   :  { %p219_p9 = pnand %p217_p8, %p214_p7 }
  0x5c   :  { %222 = shalt.err (!%p219_p9)
}
  0x5d   :  { %132 = dma.vmem_to_hbm [thread:$0]  %s127_s6, 512, %s296_s2, [#allocation4], %s230_s19, %s230_s19, %s231_s20  }
  0x5e   :  { %227 = dma.done.wait [#allocation4], 512  }
  0x5f   :  { %228 = vsyncadd [#allocation4], 4294966784 }
  0x60   :  { %136 = vsyncpa [#allocation3], 1 }
  0x61   :  { %137 = vsyncpa [#allocation6], 1 }
  0x62   :  { %138 = vsyncpa [#allocation4], 1 }

</bundles_post_ra>
